<compile_context>
chip_gen: v7x
topology: tpu7x:2x2x1
jax: 0.10.0
libtpu: 0.0.40
codegen_flags: <defaults>
</compile_context>

<pallas_src>
import math

import jax
import jax.numpy as jnp
from jax.experimental import pallas as pl
from jax.experimental.pallas import tpu as pltpu


# ---------------------------------------------------------------------------
# Kernel: one row tile of the patch matrix @ resident projection weight + bias.
# ---------------------------------------------------------------------------
def _patch_proj_kernel(p_ref, w_ref, b_ref, o_ref):
    # p_ref: (tm, K)   w_ref: (K, d_model)   b_ref: (1, d_model)   o_ref: (tm, d_model)
    acc = jnp.dot(p_ref[...], w_ref[...], preferred_element_type=jnp.float32)
    o_ref[...] = (acc + b_ref[...]).astype(o_ref.dtype)


def _vmem_capacity_bytes() -> int:
    try:
        return int(pltpu.get_tpu_info().vmem_capacity_bytes)
    except Exception:        # info query unavailable -> assume 128 MiB (v5e/v6e)
        return 128 << 20


def _choose_row_tile(M: int, K: int, N: int, in_itemsize: int, out_itemsize: int) -> int:
    """Row tile of the (M, K) patch matrix.

    Budget for (x-tile + out-tile) per grid step:
      * 128 MiB VMEM parts (v5e/v6e): ~8 MiB  -> 512-1024 row tiles at CLIP sizes.
      * 64  MiB VMEM parts (v7x):     ~5 MiB  -> double-buffered tiles stay well
        clear of the 32 MiB scoped default.
    Prefers 256-aligned divisors of M (MXU-friendly, no jnp.pad copy), then 128/8.
    """
    budget = (8 << 20) if _vmem_capacity_bytes() >= (96 << 20) else (5 << 20)
    per_row = K * in_itemsize + N * out_itemsize
    cap = max(8, min(4096, budget // max(1, per_row)))
    if M <= cap:
        return M                              # single step, full-extent block
    for align in (256, 128, 8):               # prefer MXU/lane/sublane-aligned divisors
        best = 0
        t = align
        while t <= cap:
            if M % t == 0:
                best = t
            t += align
        if best:
            return best
    # No aligned divisor: 8-aligned tile; wrapper pads the remainder (rare case:
    # M not a multiple of 8 and larger than the VMEM budget).
    return max(8, (cap // 8) * 8)


def prepare_patch_proj_params(weight, bias, *, compute_dtype=None):
    """Hoistable parameter prep: (d_model, C, ph, pw) conv weight -> (K, d_model)
    GEMM weight + f32 bias row.  Call once at setup, not per forward call."""
    d_model = weight.shape[0]
    K = weight.shape[1] * weight.shape[2] * weight.shape[3]
    w2d = weight.reshape(d_model, K).T                      # (K, d_model)
    if compute_dtype is not None:                           # explicit bf16 opt-in
        w2d = w2d.astype(compute_dtype)
    b2d = bias.reshape(1, d_model).astype(jnp.float32)      # matches f32 accumulator
    return w2d, b2d


def patch_embeddings_apply(x, w2d, b2d, patch_size):
    """x: (B, C, H, W); w2d: (K, d_model); b2d: (1, d_model).
    Returns (B, num_patches, d_model) == Conv2d(stride=patch) + flatten(2) + transpose(1,2)."""
    B, C, H, W = x.shape
    ph, pw = patch_size
    K, d_model = w2d.shape
    assert H % ph == 0 and W % pw == 0, "image size must be divisible by patch size"
    nh, nw = H // ph, W // pw
    num_patches = nh * nw
    assert K == C * ph * pw, "weight shape inconsistent with (C, patch_size)"

    # im2col for non-overlapping patches.  Reshapes are free (no data movement);
    # the transpose is one fused XLA relayout pass.  Casting to the matmul dtype
    # first lets XLA fuse the convert into that same pass (bf16 halves its traffic).
    patches = (x.astype(w2d.dtype)
                 .reshape(B, C, nh, ph, nw, pw)
                 .transpose(0, 2, 4, 1, 3, 5)
                 .reshape(B * num_patches, K))

    M = B * num_patches
    in_it = jnp.dtype(w2d.dtype).itemsize
    out_it = jnp.dtype(x.dtype).itemsize
    tm = _choose_row_tile(M, K, d_model, in_it, out_it)
    M_pad = pl.cdiv(M, tm) * tm
    if M_pad != M:   # rare fallback; _choose_row_tile normally picks divisors of M
        patches = jnp.pad(patches, ((0, M_pad - M), (0, 0)))

    cost = pl.CostEstimate(
        flops=2 * M_pad * K * d_model,
        transcendentals=0,
        bytes_accessed=(M_pad * K * in_it
                        + K * d_model * in_it
                        + d_model * 4
                        + M_pad * d_model * out_it),
    )

    # Rough VMEM need: double-buffered x/out tiles + double-buffered resident weight.
    # (pl.Buffered(1) single-buffering of the constant-index weight was considered
    #  but left off for portability; the extra copy is small at CLIP sizes.)
    vmem_need = (2 * tm * (K * in_it + d_model * out_it)
                 + 2 * K * d_model * in_it + 2 * d_model * 4 + (2 << 20))
    vmem_limit = int(min(max(vmem_need, 32 << 20), (7 * _vmem_capacity_bytes()) // 8))

    out = pl.pallas_call(
        _patch_proj_kernel,
        out_shape=jax.ShapeDtypeStruct((M_pad, d_model), x.dtype),
        grid_spec=pltpu.PrefetchScalarGridSpec(
            num_scalar_prefetch=0,
            grid=(M_pad // tm,),
            in_specs=[
                pl.BlockSpec((tm, K), lambda i: (i, 0)),        # row tile of patches
                pl.BlockSpec((K, d_model), lambda i: (0, 0)),   # weight resident in VMEM
                pl.BlockSpec((1, d_model), lambda i: (0, 0)),   # f32 bias resident in VMEM
            ],
            out_specs=pl.BlockSpec((tm, d_model), lambda i: (i, 0)),
        ),
        compiler_params=pltpu.CompilerParams(
            dimension_semantics=("parallel",),   # v7x: shard row tiles across both TCs
            vmem_limit_bytes=vmem_limit,
        ),
        cost_estimate=cost,
    )(patches, w2d, b2d)

    if M_pad != M:
        out = out[:M]
    return out.reshape(B, num_patches, d_model)


def patch_embeddings_forward(x, weight, bias, patch_size, *, compute_dtype=None):
    """Convenience wrapper matching the PyTorch module's forward(x); prefer calling
    prepare_patch_proj_params() once and patch_embeddings_apply() in the hot loop."""
    w2d, b2d = prepare_patch_proj_params(weight, bias, compute_dtype=compute_dtype)
    return patch_embeddings_apply(x, w2d, b2d, patch_size)


if __name__ == "__main__":
    # Small shapes consistent with the module: batch=2, channels=4, 16x16 image,
    # 4x4 patches, d_model=32 -> num_patches = 16.
    d_model = 32
    img_size = (16, 16)
    patch_size = (4, 4)
    n_channels = 4
    batch = 2

    key = jax.random.PRNGKey(0)
    kx, kw, kb = jax.random.split(key, 3)
    x = jax.random.normal(kx, (batch, n_channels, *img_size), dtype=jnp.float32)

    # Conv2d-style init (uniform in +-1/sqrt(fan_in)), deterministic.
    fan_in = n_channels * patch_size[0] * patch_size[1]
    bound = 1.0 / math.sqrt(fan_in)
    weight = jax.random.uniform(kw, (d_model, n_channels, *patch_size),
                                jnp.float32, -bound, bound)
    bias = jax.random.uniform(kb, (d_model,), jnp.float32, -bound, bound)

    # Parameter prep hoisted out of the forward path (done once at setup).
    w2d, b2d = prepare_patch_proj_params(weight, bias)
    fwd = jax.jit(lambda xx, ww, bb: patch_embeddings_apply(xx, ww, bb, patch_size))
    out = jax.block_until_ready(fwd(x, w2d, b2d))

    # Reference: plain-JAX conv matching nn.Conv2d semantics, then flatten+transpose.
    ref_conv = jax.lax.conv_general_dilated(
        x, weight, window_strides=patch_size, padding="VALID",
        dimension_numbers=("NCHW", "OIHW", "NCHW"))
    ref = (ref_conv + bias[None, :, None, None]).reshape(batch, d_model, -1).transpose(0, 2, 1)

    num_patches = (img_size[0] // patch_size[0]) * (img_size[1] // patch_size[1])
    assert out.shape == (batch, num_patches, d_model), out.shape
    assert jnp.allclose(out, ref, atol=1e-4, rtol=1e-4), "mismatch vs reference (f32 path)"

    # Optional bf16 matmul path (explicit precision tradeoff; f32 accumulate/bias/output).
    w2d_b, b2d_b = prepare_patch_proj_params(weight, bias, compute_dtype=jnp.bfloat16)
    fwd_b = jax.jit(lambda xx, ww, bb: patch_embeddings_apply(xx, ww, bb, patch_size))
    out_b = jax.block_until_ready(fwd_b(x, w2d_b, b2d_b))
    assert out_b.shape == ref.shape
    assert jnp.allclose(out_b, ref, atol=2e-1, rtol=2e-1), "bf16 path diverged"

    print("KERNEL_OK")
</pallas_src>

<mosaic_0001>
module attributes {stable_mosaic.version = 11 : i64} {
  func.func @_patch_proj_kernel(%arg0: i32, %arg1: memref<32x64xf32, #tpu.memory_space<vmem>>, %arg2: memref<64x32xf32, #tpu.memory_space<vmem>>, %arg3: memref<1x32xf32, #tpu.memory_space<vmem>>, %arg4: memref<32x32xf32, #tpu.memory_space<vmem>>) attributes {dimension_semantics = [#tpu.dimension_semantics<parallel>], iteration_bounds = array<i64: 1>, scalar_prefetch = 0 : i64, scratch_operands = 0 : i64, tpu.core_type = #tpu.core_type<tc>, window_params = [{transform_indices = @transform_0, window_bounds = array<i64: 32, 64>}, {pipeline_mode = #tpu.pipeline_mode<synchronous>, transform_indices = @transform_1, window_bounds = array<i64: 64, 32>}, {pipeline_mode = #tpu.pipeline_mode<synchronous>, transform_indices = @transform_2, window_bounds = array<i64: 1, 32>}, {transform_indices = @transform_3, window_bounds = array<i64: 32, 32>}]} {
    %c0 = arith.constant 0 : index
    %c0_0 = arith.constant 0 : index
    %0 = vector.load %arg1[%c0, %c0_0] : memref<32x64xf32, #tpu.memory_space<vmem>>, vector<32x64xf32>
    %c0_1 = arith.constant 0 : index
    %c0_2 = arith.constant 0 : index
    %1 = vector.load %arg2[%c0_1, %c0_2] : memref<64x32xf32, #tpu.memory_space<vmem>>, vector<64x32xf32>
    %cst = arith.constant dense<0.000000e+00> : vector<32x32xf32>
    %2 = tpu.matmul %0, %1, %cst {dimension_numbers = #tpu.dot_dimension_numbers<[1], [0], [0], [1], [0, 0, 1, 1], [], []>} : vector<32x64xf32>, vector<64x32xf32>, vector<32x32xf32> -> vector<32x32xf32>
    %c0_3 = arith.constant 0 : index
    %c0_4 = arith.constant 0 : index
    %3 = vector.load %arg3[%c0_3, %c0_4] : memref<1x32xf32, #tpu.memory_space<vmem>>, vector<1x32xf32>
    %4 = vector.broadcast %3 : vector<1x32xf32> to vector<32x32xf32>
    %5 = arith.addf %2, %4 : vector<32x32xf32>
    %c0_5 = arith.constant 0 : index
    %c0_6 = arith.constant 0 : index
    %6 = vector.load %arg4[%c0_5, %c0_6] : memref<32x32xf32, #tpu.memory_space<vmem>>, vector<32x32xf32>
    tpu.vector_store %arg4[%c0_5, %c0_6], %5 {strides = array<i32>} : memref<32x32xf32, #tpu.memory_space<vmem>>, vector<32x32xf32>,
    return
  }
  func.func @transform_0(%arg0: i32) -> (i32, i32) {
    %c0_i32 = arith.constant 0 : i32
    %c0_i32_0 = arith.constant 0 : i32
    return %arg0, %c0_i32 : i32, i32
  }
  func.func @transform_1(%arg0: i32) -> (i32, i32) {
    %c0_i32 = arith.constant 0 : i32
    %c0_i32_0 = arith.constant 0 : i32
    %c0_i32_1 = arith.constant 0 : i32
    return %c0_i32, %c0_i32_0 : i32, i32
  }
  func.func @transform_2(%arg0: i32) -> (i32, i32) {
    %c0_i32 = arith.constant 0 : i32
    %c0_i32_0 = arith.constant 0 : i32
    %c0_i32_1 = arith.constant 0 : i32
    return %c0_i32, %c0_i32_0 : i32, i32
  }
  func.func @transform_3(%arg0: i32) -> (i32, i32) {
    %c0_i32 = arith.constant 0 : i32
    %c0_i32_0 = arith.constant 0 : i32
    return %arg0, %c0_i32 : i32, i32
  }
}

</mosaic_0001>

<bundles_post_ra>
// kernel: _lambda_.1
= control target key start
LH: loop header
LB: loop body
LE: loop exit
PB: predicated region body
PF: predicated region fallthrough
CT: control target
= control target key end

     0   :  { %vm34_vm0 = vcmask 523264   ;;  %s321_s0 = inlined_call_operand.vmem [shape: f32[32,64], index: 0, kind: input, shape index: {}]   ;;  %s322_s1 = inlined_call_operand.vmem [shape: f32[64,32], index: 1, kind: input, shape index: {}]   ;;  %s323_s2 = inlined_call_operand.vmem [shape: f32[1,32], index: 2, kind: input, shape index: {}]   ;;  %s324_s3 = inlined_call_operand.hbm [shape: f32[32,32], index: 3, kind: output, shape index: {}]  }
   0x1   :  { %v19_v0 = vld [vmem:[%s322_s1] sm:$0xff]  ;;  %v20_v1 = vld [vmem:[%s322_s1 + $0x8] sm:$0xff]  ;;  %v21_v2 = vld [vmem:[%s322_s1 + $0x10] sm:$0xff] }
   0x2   :  { %v192_v3 = vpack.c.bf16 %v20_v1, %v19_v0  ;;  %v22_v4 = vld [vmem:[%s322_s1 + $0x18] sm:$0xff]  ;;  %v23_v6 = vld [vmem:[%s322_s1 + $0x20] sm:$0xff]  ;;  %v24_v7 = vld [vmem:[%s322_s1 + $0x28] sm:$0xff] }
   0x3   :  { %v196_v5 = vpack.c.bf16 %v22_v4, %v21_v2  ;;  %v15_v8 = vld [vmem:[%s321_s0] sm:$0xff]  ;;  %v17_v9 = vld [vmem:[%s321_s0 + $0x10] sm:$0xff] }
   0x4   :  { %193 = vmatprep.subr.bf16.mxu0 %v192_v3  ;;  %208 = vmatprep.subr.bf16.mxu1 %v192_v3 }
   0x5   :  { %195 = vmatpush3.bf16.msra.mxu0 %v192_v3  ;;  %212 = vmatpush3.bf16.msra.mxu1 %v192_v3 }
   0x6   :  { %8 = vsyncpa [#allocation3], 0  ;;  %197 = vmatprep.subr.bf16.mxu0 %v196_v5  ;;  %209 = vmatprep.subr.bf16.mxu1 %v196_v5  ;;  %v200_v10 = vpack.c.bf16 %v24_v7, %v23_v6  ;;  %v25_v11 = vld [vmem:[%s322_s1 + $0x30] sm:$0xff]  ;;  %v26_v12 = vld [vmem:[%s322_s1 + $0x38] sm:$0xff]  ;;  %s243_s10 = smov [#allocation2]   ;;  %vm132_vm1 = vcmask 261120  }
   0x7   :  { %186 = vmatprep.mubr.msk.f32.mxu0 %vm34_vm0, %v15_v8  ;;  %189 = vmatprep.mubr.msk.f32.mxu1 %vm34_vm0, %v17_v9  ;;  %v204_v13 = vpack.c.bf16 %v26_v12, %v25_v11  ;;  %v16_v14 = vld [vmem:[%s321_s0 + $0x8] sm:$0xff]  ;;  %v18_v15 = vld [vmem:[%s321_s0 + $0x18] sm:$0xff]  ;;  %v153_v16 = vld [vmem:[%s323_s2] ss:$0 sm:$0xff]  ;;  %s142_s11 = sshll.u32 %s243_s10, 4  ;;  %s143_s11 = int_to_ptr.vmem [resolvable:$true] %s142_s11 }
   0x8   :  { %s219_s0 = scalar_lea.vmem %s143_s11, 512  ;;  %p224_p1 = scmp.lt.s32.totalorder %s143_s11, %s143_s11 }
   0x9   :  { %199 = vmatpush3.bf16.msra.mxu0 %v196_v5  ;;  %213 = vmatpush3.bf16.msra.mxu1 %v196_v5  ;;  %p220_p0 = scmp.ne.s32.totalorder %s143_s11, %s219_s0  ;;  %p225_p2 = scmp.lt.s32.totalorder %s219_s0, %s219_s0 }
   0xa   :  { %201 = vmatprep.subr.bf16.mxu0 %v200_v10  ;;  %210 = vmatprep.subr.bf16.mxu1 %v200_v10 }
   0xb   :  { %p226_p3 = por %p225_p2, %p224_p1 }
   0xd   :  { %203 = vmatpush3.bf16.msra.mxu0 %v200_v10  ;;  %214 = vmatpush3.bf16.msra.mxu1 %v200_v10  ;;  %p227_p4 = pnand %p226_p3, %p220_p0 }
   0xe   :  { %205 = vmatprep.subr.bf16.mxu0 %v204_v13  ;;  %211 = vmatprep.subr.bf16.mxu1 %v204_v13 }
  0x11   :  { %207 = vmatpush3.bf16.msra.mxu0 %v204_v13  ;;  %215 = vmatpush3.bf16.msra.mxu1 %v204_v13 }
  0x14   :  { %187 = vmatmul.mubr.msk.f32.vlgmr.msra.gmra.mrb[0].mxu0 %vm34_vm0, %v16_v14  ;;  %190 = vmatmul.mubr.msk.f32.vlgmr.msra.gmra.mrb[0].mxu1 %vm34_vm0, %v18_v15 }
  0xe7   :  { %v188_v17 = vpop.f32.mrb[0].mxu0  ;;  %v191_v18 = vpop.f32.mrb[0].mxu1 }
  0xe8   :  { %v119_v19 = vadd.f32 %v188_v17, %v153_v16  ;;  %v129_v20 = vadd.f32 %v191_v18, %v153_v16  ;;  %v113_v21 = vpop.f32.mrb[1].mxu0  ;;  %v123_v22 = vpop.f32.mrb[1].mxu1 }
  0xe9   :  { %v114_v23 = vadd.f32 %v153_v16, %v113_v21  ;;  %v124_v24 = vadd.f32 %v153_v16, %v123_v22 }
  0xea   :  { %134 = vst.msk [vmem:[#allocation2 + $0x8] sm:$0xff] %vm132_vm1, %v119_v19  ;;  %136 = vst.msk [vmem:[#allocation2 + $0x18] sm:$0xff] %vm132_vm1, %v129_v20 }
  0xeb   :  { %133 = vst.msk [vmem:[#allocation2] sm:$0xff] %vm132_vm1, %v114_v23  ;;  %135 = vst.msk [vmem:[#allocation2 + $0x10] sm:$0xff] %vm132_vm1, %v124_v24 }
  0xec   :  { %230 = shalt.err (!%p227_p4)
}
  0xed   :  { %s231_s13 = scalar_lea.hbm %s324_s3, 512 }
  0xee   :  { %p232_p5 = scmp.ne.s32.totalorder %s324_s3, %s231_s13  ;;  %p235_p6 = scmp.lt.u32.totalorder %s231_s13, %s324_s3 }
  0xf0   :  { %p237_p7 = pnand %p235_p6, %p232_p5 }
  0xf2   :  { %240 = shalt.err (!%p237_p7)
}
  0xf3   :  { %s244_s18 = smov 128   ;;  %s245_s19 = smov 8  }
  0xf4   :  { %148 = dma.vmem_to_hbm [thread:$0]  %s143_s11, 512, %s324_s3, [#allocation3], %s244_s18, %s244_s18, %s245_s19  }
  0xf5   :  { %241 = dma.done.wait [#allocation3], 512  }
  0xf6   :  { %242 = vsyncadd [#allocation3], 4294966784 }
  0xf7   :  { %152 = vsyncpa [#allocation3], 1 }

</bundles_post_ra>
